<compile_context>
chip_gen: v7x
topology: tpu7x:2x2x1
jax: 0.10.0
libtpu: 0.0.40
codegen_flags: <defaults>
</compile_context>

<pallas_src>
import functools

import jax
import jax.numpy as jnp
from jax.experimental import pallas as pl
from jax.experimental.pallas import tpu as pltpu


def _rmsnorm_kernel(x_ref, w_ref, o_ref, *, eps, inv_dim):
    # x_ref: (row_tile, dim)   w_ref: (1, dim) f32   o_ref: (row_tile, dim)
    xf = x_ref[...].astype(jnp.float32)
    ssq = jnp.sum(xf * xf, axis=-1, keepdims=True)        # (row_tile, 1) f32
    inv_rms = jax.lax.rsqrt(ssq * inv_dim + eps)          # (row_tile, 1) f32
    # Entire scale in f32 (reference numerics); single cast at the store.
    # NOTE: in the ragged last grid block the padded rows hold garbage and
    # may produce inf/NaN here -- harmless because per-row results are
    # independent and OOB rows are never written back.
    o_ref[...] = (xf * inv_rms * w_ref[...]).astype(o_ref.dtype)


def _round_up(v, m):
    return ((v + m - 1) // m) * m


def _num_tensorcores():
    # v7x has 2 TensorCores per chip; v5e/v6e have 1.
    # TODO(synk): if profiling shows the "parallel" row axis does not shard
    # across both v7x TCs, switch to pltpu.CORE_PARALLEL / a core_map split.
    try:
        kind = jax.devices()[0].device_kind.lower()
        if "v7" in kind:
            return 2
    except Exception:
        pass
    return 1


def _vmem_capacity_bytes():
    # Real per-core VMEM when the query is available; otherwise a v7x-safe
    # 64 MiB fallback (v5e/v6e have 128 MiB).
    try:
        return int(pltpu.get_tpu_info().vmem_capacity_bytes)
    except Exception:
        return 64 * 1024 * 1024


def _per_row_vmem_bytes(dim, itemsize):
    # Double-buffered input + output tiles (2 bufs each, input dtype) plus
    # one f32 working copy of the tile inside the kernel body.
    return (2 * 2 * itemsize + 4) * dim


def _choose_row_tile(n_rows, dim, itemsize, vmem_cap_bytes, num_tc):
    # Sublane packing: 8 rows (32-bit), 16 (16-bit), 32 (8-bit).
    pack = max(8, 32 // max(itemsize, 1))
    # Leave ~30% of VMEM for the weight, semaphores and compiler temps.
    vmem_budget = int(vmem_cap_bytes * 0.7)
    per_row = _per_row_vmem_bytes(dim, itemsize)
    max_rows = max(pack, vmem_budget // per_row)
    # VMEM-derived cap (not a fixed 1024): small dims get 2k-4k row tiles so
    # each grid step moves enough bytes to amortize the fixed step overhead.
    row_tile = min(4096, max_rows)
    # Only on multi-TC chips: keep >= num_tc grid blocks (when there is
    # enough work) so the parallel row axis load-balances across cores.
    if num_tc > 1 and n_rows >= num_tc * pack:
        per_core = _round_up(pl.cdiv(n_rows, num_tc), pack)
        row_tile = min(row_tile, per_core)
    # Never bigger than the (packed-up) number of rows.
    row_tile = min(row_tile, _round_up(n_rows, pack))
    row_tile = max(pack, (row_tile // pack) * pack)
    return row_tile


def rmsnorm(x, weight, eps=1e-6, row_tile=None):
    """RMSNorm over the last axis of x, scaled by `weight` (shape (dim,))."""
    orig_shape = x.shape
    dim = orig_shape[-1]
    x2d = x.reshape(-1, dim)
    n_rows = x2d.shape[0]
    itemsize = jnp.dtype(x.dtype).itemsize

    vmem_cap = _vmem_capacity_bytes()
    num_tc = _num_tensorcores()

    if row_tile is None:
        row_tile = _choose_row_tile(n_rows, dim, itemsize, vmem_cap, num_tc)

    grid = (pl.cdiv(n_rows, row_tile),)  # ragged last block, no HBM-side pad

    # Weight cast to f32 once here (outside the kernel); it stays resident in
    # VMEM via the constant index_map, so no per-step cast in the loop body.
    w2d = weight.astype(jnp.float32).reshape(1, dim)

    # Scoped VMEM limit derived from the SAME byte accounting as the tile
    # choice, with headroom, never above ~90% of physical VMEM.
    tile_bytes = row_tile * dim * itemsize          # one in OR out buffer
    f32_tile_bytes = row_tile * dim * 4             # in-kernel f32 working copy
    w_bytes = dim * 4
    needed = 2 * 2 * tile_bytes + f32_tile_bytes + 2 * w_bytes
    vmem_limit = max(32 * 1024 * 1024, int(needed * 1.3))
    vmem_limit = min(vmem_limit, int(vmem_cap * 0.9))

    kernel = functools.partial(
        _rmsnorm_kernel, eps=float(eps), inv_dim=float(1.0 / dim)
    )

    out = pl.pallas_call(
        kernel,
        out_shape=jax.ShapeDtypeStruct((n_rows, dim), x.dtype),
        grid_spec=pltpu.PrefetchScalarGridSpec(
            num_scalar_prefetch=0,
            grid=grid,
            in_specs=[
                pl.BlockSpec((row_tile, dim), lambda i: (i, 0)),
                pl.BlockSpec((1, dim), lambda i: (0, 0)),
            ],
            out_specs=pl.BlockSpec((row_tile, dim), lambda i: (i, 0)),
        ),
        compiler_params=pltpu.CompilerParams(
            dimension_semantics=("parallel",),
            vmem_limit_bytes=vmem_limit,
        ),
    )(x2d, w2d)

    return out.reshape(orig_shape)


def _reference(x, weight, eps):
    xf = x.astype(jnp.float32)
    rms = jnp.sqrt(jnp.mean(xf * xf, axis=-1, keepdims=True) + eps)
    return (weight.astype(jnp.float32) * (xf / rms)).astype(x.dtype)


if __name__ == "__main__":
    key = jax.random.PRNGKey(0)
    eps = 1e-6

    # Small shape consistent with the module: batch=2, seq=8, hidden=32.
    batch, seq, hidden = 2, 8, 32
    x = jax.random.normal(key, (batch, seq, hidden), dtype=jnp.float32)
    # weight = ones(dim), matching nn.Parameter(torch.ones(dim))
    weight = jnp.ones((hidden,), dtype=jnp.float32)

    out = jax.block_until_ready(rmsnorm(x, weight, eps=eps))
    ref = _reference(x, weight, eps)
    assert out.shape == x.shape
    assert jnp.allclose(out, ref, atol=1e-5, rtol=1e-5)

    # Ragged-last-block path (rows not a multiple of the tile / pack).
    k2 = jax.random.PRNGKey(1)
    x2 = jax.random.normal(k2, (3, 5, 128), dtype=jnp.float32)
    w2 = jnp.ones((128,), dtype=jnp.float32)
    out2 = jax.block_until_ready(rmsnorm(x2, w2, eps=eps))
    ref2 = _reference(x2, w2, eps)
    assert out2.shape == x2.shape
    assert jnp.allclose(out2, ref2, atol=1e-5, rtol=1e-5)

    # bf16 input with non-trivial f32 weight: exercises the f32 compute path
    # (normalize + scale in float32, cast once at the store).
    k3 = jax.random.PRNGKey(2)
    x3 = jax.random.normal(k3, (2, 8, 256), dtype=jnp.bfloat16)
    w3 = jax.random.normal(jax.random.PRNGKey(3), (256,), dtype=jnp.float32)
    out3 = jax.block_until_ready(rmsnorm(x3, w3, eps=eps))
    ref3 = _reference(x3, w3, eps)
    assert out3.shape == x3.shape
    assert jnp.allclose(out3.astype(jnp.float32), ref3.astype(jnp.float32),
                        atol=2e-2, rtol=2e-2)

    print("KERNEL_OK")
</pallas_src>

<mosaic_0001>
module attributes {stable_mosaic.version = 11 : i64} {
  func.func @_rmsnorm_kernel(%arg0: i32, %arg1: memref<16x32xf32, #tpu.memory_space<vmem>>, %arg2: memref<1x32xf32, #tpu.memory_space<vmem>>, %arg3: memref<16x32xf32, #tpu.memory_space<vmem>>) attributes {dimension_semantics = [#tpu.dimension_semantics<parallel>], iteration_bounds = array<i64: 1>, scalar_prefetch = 0 : i64, scratch_operands = 0 : i64, tpu.core_type = #tpu.core_type<tc>, window_params = [{transform_indices = @transform_0, window_bounds = array<i64: 16, 32>}, {pipeline_mode = #tpu.pipeline_mode<synchronous>, transform_indices = @transform_1, window_bounds = array<i64: 1, 32>}, {transform_indices = @transform_2, window_bounds = array<i64: 16, 32>}]} {
    %c0 = arith.constant 0 : index
    %c0_0 = arith.constant 0 : index
    %0 = vector.load %arg1[%c0, %c0_0] : memref<16x32xf32, #tpu.memory_space<vmem>>, vector<16x32xf32>
    %1 = arith.mulf %0, %0 : vector<16x32xf32>
    %cst = arith.constant dense<0.000000e+00> : vector<16xf32>
    %2 = vector.multi_reduction <add>, %1, %cst [1] : vector<16x32xf32> to vector<16xf32>
    %3 = vector.shape_cast %2 : vector<16xf32> to vector<16x1xf32>
    %cst_1 = arith.constant 3.125000e-02 : f32
    %4 = vector.broadcast %cst_1 : f32 to vector<16x1xf32>
    %5 = arith.mulf %3, %4 : vector<16x1xf32>
    %cst_2 = arith.constant 9.99999997E-7 : f32
    %6 = vector.broadcast %cst_2 : f32 to vector<16x1xf32>
    %7 = arith.addf %5, %6 : vector<16x1xf32>
    %8 = math.rsqrt %7 : vector<16x1xf32>
    %9 = vector.broadcast %8 : vector<16x1xf32> to vector<16x32xf32>
    %10 = arith.mulf %0, %9 : vector<16x32xf32>
    %c0_3 = arith.constant 0 : index
    %c0_4 = arith.constant 0 : index
    %11 = vector.load %arg2[%c0_3, %c0_4] : memref<1x32xf32, #tpu.memory_space<vmem>>, vector<1x32xf32>
    %12 = vector.broadcast %11 : vector<1x32xf32> to vector<16x32xf32>
    %13 = arith.mulf %10, %12 : vector<16x32xf32>
    %c0_5 = arith.constant 0 : index
    %c0_6 = arith.constant 0 : index
    %14 = vector.load %arg3[%c0_5, %c0_6] : memref<16x32xf32, #tpu.memory_space<vmem>>, vector<16x32xf32>
    tpu.vector_store %arg3[%c0_5, %c0_6], %13 {strides = array<i32>} : memref<16x32xf32, #tpu.memory_space<vmem>>, vector<16x32xf32>,
    return
  }
  func.func @transform_0(%arg0: i32) -> (i32, i32) {
    %c0_i32 = arith.constant 0 : i32
    %c0_i32_0 = arith.constant 0 : i32
    return %arg0, %c0_i32 : i32, i32
  }
  func.func @transform_1(%arg0: i32) -> (i32, i32) {
    %c0_i32 = arith.constant 0 : i32
    %c0_i32_0 = arith.constant 0 : i32
    %c0_i32_1 = arith.constant 0 : i32
    return %c0_i32, %c0_i32_0 : i32, i32
  }
  func.func @transform_2(%arg0: i32) -> (i32, i32) {
    %c0_i32 = arith.constant 0 : i32
    %c0_i32_0 = arith.constant 0 : i32
    return %arg0, %c0_i32 : i32, i32
  }
}

</mosaic_0001>

<bundles_post_ra>
// kernel: tpu_custom_call.1
= control target key start
LH: loop header
LB: loop body
LE: loop exit
PB: predicated region body
PF: predicated region fallthrough
CT: control target
= control target key end

     0   :  { %7 = vsyncpa [#allocation3], 0  ;;  %s186_s0 = inlined_call_operand.hbm [shape: f32[16,32], index: 0, kind: input, shape index: {}]   ;;  %s187_s1 = inlined_call_operand.vmem [shape: f32[1,32], index: 1, kind: input, shape index: {}]   ;;  %s188_s2 = inlined_call_operand.hbm [shape: f32[16,32], index: 2, kind: output, shape index: {}]  }
   0x1   :  { %8 = vsyncpa [#allocation4], 0  ;;  %s130_s9 = smov [#allocation2]   ;;  %s82_s13 = scalar_lea.hbm %s186_s0, 256 }
   0x2   :  { %s14_s10 = sshll.u32 %s130_s9, 4  ;;  %p83_p0 = scmp.ne.s32.totalorder %s186_s0, %s82_s13  ;;  %s15_s10 = int_to_ptr.vmem [resolvable:$true] %s14_s10 }
   0x3   :  { %p86_p1 = scmp.lt.u32.totalorder %s82_s13, %s186_s0 }
   0x5   :  { %p88_p2 = pnand %p86_p1, %p83_p0 }
   0x7   :  { %91 = shalt.err (!%p88_p2)
}
   0x8   :  { %s92_s18 = scalar_lea.vmem %s15_s10, 256  ;;  %p97_p4 = scmp.lt.s32.totalorder %s15_s10, %s15_s10 }
   0x9   :  { %p93_p3 = scmp.ne.s32.totalorder %s15_s10, %s92_s18  ;;  %p98_p5 = scmp.lt.s32.totalorder %s92_s18, %s92_s18 }
   0xb   :  { %p99_p6 = por %p98_p5, %p97_p4 }
   0xd   :  { %p100_p7 = pnand %p99_p6, %p93_p3 }
   0xf   :  { %103 = shalt.err (!%p100_p7)
}
  0x10   :  { %s131_s19 = smov 128   ;;  %s132_s20 = smov 8  }
  0x11   :  { %20 = dma.hbm_to_vmem [thread:$0]  %s186_s0, 256, %s15_s10, [#allocation3], %s131_s19, %s131_s19, %s132_s20  }
  0x12   :  { %126 = dma.done.wait [#allocation3], 256  }
  0x13   :  { %127 = vsyncadd [#allocation3], 4294967040  ;;  %v26_v0 = vld [vmem:[#allocation2] sm:$0xff]  ;;  %vm30_vm0 = vcmask 261120   ;;  %v27_v1 = vld [vmem:[#allocation2 + $0x8] sm:$0xff]  ;;  %s133_s24 = smov [#allocation5]  }
  0x14   :  { %v28_v2 = vmul.f32 %v26_v0, %v26_v0  ;;  %v29_v3 = vmul.f32 %v27_v1, %v27_v1  ;;  %v73_v13 = vld [vmem:[%s187_s1] ss:$0 sm:$0xff]  ;;  %s61_s25 = sshll.u32 %s133_s24, 4  ;;  %s62_s25 = int_to_ptr.vmem [resolvable:$true] %s61_s25 }
  0x15   :  { %s104_s26 = scalar_lea.vmem %s62_s25, 256  ;;  %p109_p9 = scmp.lt.s32.totalorder %s62_s25, %s62_s25 }
  0x16   :  { %v31_v4 = vsel %vm30_vm0, %v28_v2, 0.0  ;;  %v34_v5 = vsel %vm30_vm0, %v29_v3, 0.0  ;;  %p105_p8 = scmp.ne.s32.totalorder %s62_s25, %s104_s26  ;;  %p110_p10 = scmp.lt.s32.totalorder %s104_s26, %s104_s26 }
  0x17   :  { %32 = vadd.xlane.f32.xlu0 %v31_v4 }
  0x18   :  { %p111_p11 = por %p110_p10, %p109_p9 }
  0x1a   :  { %p112_p12 = pnand %p111_p11, %p105_p8 }
  0x1b   :  { %35 = vadd.xlane.f32.xlu0 %v34_v5 }
  0xa4   :  { %v33_v6 = vpop.xlane.xlu0 %32 }
  0xa5   :  { %v37_v7 = vmul.f32 0.03125, %v33_v6 }
  0xa7   :  { %v39_v8 = vadd.f32 1e-06, %v37_v7 }
  0xa8   :  { %v36_v9 = vpop.xlane.xlu0 %35 }
  0xa9   :  { %78 = vrsqrt.f32 %v39_v8  ;;  %v38_v10 = vmul.f32 0.03125, %v36_v9 }
  0xab   :  { %v40_v11 = vadd.f32 1e-06, %v38_v10 }
  0xad   :  { %80 = vrsqrt.f32 %v40_v11 }
  0xb3   :  { %v79_v12 = vpop.eup %78 }
  0xb4   :  { %v43_v14 = vmul.f32 %v79_v12, %v26_v0 }
  0xb6   :  { %v52_v15 = vmul.f32 %v73_v13, %v43_v14 }
  0xb7   :  { %v81_v16 = vpop.eup %80 }
  0xb8   :  { %v44_v17 = vmul.f32 %v81_v16, %v27_v1  ;;  %54 = vst.msk [vmem:[#allocation5] sm:$0xff] %vm30_vm0, %v52_v15 }
  0xba   :  { %v53_v18 = vmul.f32 %v73_v13, %v44_v17 }
  0xbc   :  { %55 = vst.msk [vmem:[#allocation5 + $0x8] sm:$0xff] %vm30_vm0, %v53_v18 }
  0xbd   :  { %115 = shalt.err (!%p112_p12)
}
  0xbe   :  { %s116_s28 = scalar_lea.hbm %s188_s2, 256 }
  0xbf   :  { %p117_p13 = scmp.ne.s32.totalorder %s188_s2, %s116_s28  ;;  %p120_p0 = scmp.lt.u32.totalorder %s116_s28, %s188_s2 }
  0xc1   :  { %p122_p1 = pnand %p120_p0, %p117_p13 }
  0xc3   :  { %125 = shalt.err (!%p122_p1)
}
  0xc4   :  { %67 = dma.vmem_to_hbm [thread:$0]  %s62_s25, 256, %s188_s2, [#allocation4], %s131_s19, %s131_s19, %s132_s20  }
  0xc5   :  { %128 = dma.done.wait [#allocation4], 256  }
  0xc6   :  { %129 = vsyncadd [#allocation4], 4294967040 }
  0xc7   :  { %71 = vsyncpa [#allocation3], 1 }
  0xc8   :  { %72 = vsyncpa [#allocation4], 1 }

</bundles_post_ra>
